<compile_context>
chip_gen: v6e
topology: v6e:2x2x1
jax: 0.10.0
libtpu: 0.0.40
codegen_flags: <defaults>
</compile_context>

<pallas_src>
from functools import partial

import jax
import jax.numpy as jnp
from jax import lax
from jax.experimental import pallas as pl
from jax.experimental.pallas import tpu as pltpu


def _rnn_acceptor_kernel(ids_ref,   # VMEM (S, 1)   int32  token ids
                         xg_ref,    # VMEM (V, 4H)  f32    emb@W_ih^T + b_ih + b_hh
                         w_ref,     # VMEM (6H, 4H) bf16   [W_hh^T ; W1^T pad ; W2^T pad]
                         b_ref,     # VMEM (2, 4H)  f32    [b1 pad ; b2 pad]
                         out_ref):  # VMEM (1, T)   f32
    S = ids_ref.shape[0]
    V, W4 = xg_ref.shape
    H = W4 // 4
    T = out_ref.shape[1]

    # ---- Fused embedding gather + input projection: one one-hot MXU pass ----
    # xg[t] = emb[id_t] @ W_ih^T + (b_ih + b_hh)   -> (S, 4H) f32, stays in vregs
    ids = ids_ref[...]                                           # (S, 1) int32
    vocab_iota = lax.broadcasted_iota(jnp.int32, (S, V), 1)      # (S, V)
    onehot = (vocab_iota == ids).astype(jnp.float32)             # (S, V) exact 0/1
    xg = jnp.dot(onehot, xg_ref[...],
                 preferred_element_type=jnp.float32)             # (S, 4H) f32

    # ---- Static, aligned slices of the packed weight/bias buffers (free) ----
    whh = w_ref[0:H, :]          # (H, 4H)  bf16   W_hh^T
    w1p = w_ref[H:2 * H, :]      # (H, 4H)  bf16   linear1.weight^T, cols >= M are 0
    w2p = w_ref[2 * H:6 * H, :]  # (4H, 4H) bf16   linear2.weight^T in top-left block
    b1 = b_ref[0:1, :]           # (1, 4H)  f32    zero beyond M
    b2 = b_ref[1:2, :]           # (1, 4H)  f32    zero beyond T

    # ---- LSTM recurrence: h/c live in vregs, fully unrolled (S static) ------
    h = jnp.zeros((1, H), jnp.float32)
    c = jnp.zeros((1, H), jnp.float32)
    for t in range(S):
        gates = xg[t:t + 1, :] + jnp.dot(h.astype(jnp.bfloat16), whh,
                                         preferred_element_type=jnp.float32)
        # Two full-(1,4H)-vreg EUP passes, then cheap lane slices (order i,f,g,o).
        sig = jax.nn.sigmoid(gates)
        tnh = jnp.tanh(gates)
        i_g = sig[:, 0 * H:1 * H]
        f_g = sig[:, 1 * H:2 * H]
        g_g = tnh[:, 2 * H:3 * H]
        o_g = sig[:, 3 * H:4 * H]
        c = f_g * c + i_g * g_g
        h = o_g * jnp.tanh(c)

    # ---- MLP head on the last hidden state (full-lane zero-padded ops) ------
    o1 = jnp.tanh(jnp.dot(h.astype(jnp.bfloat16), w1p,
                          preferred_element_type=jnp.float32) + b1)   # (1, 4H)
    o2 = jnp.dot(o1.astype(jnp.bfloat16), w2p,
                 preferred_element_type=jnp.float32) + b2             # (1, 4H)
    out_ref[...] = o2[:, :T]


def prepare_params(params):
    """One-time parameter prep: fold emb+W_ih+biases, pack weights, cast."""
    H = params["w_hh"].shape[1]
    M = params["w1"].shape[0]
    T = params["w2"].shape[0]
    W4 = 4 * H

    # (V, 4H) f32: embedding lookup + input projection + both LSTM biases.
    xg_table = (params["emb"] @ params["w_ih"].T
                + params["b_ih"] + params["b_hh"]).astype(jnp.float32)

    # One contiguous bf16 weight buffer (1 DMA instead of 3):
    #   rows [0, H)    : W_hh^T                      (H, 4H)
    #   rows [H, 2H)   : linear1.weight^T, lane-pad  (H, 4H), cols >= M zero
    #   rows [2H, 6H)  : linear2.weight^T, embedded  (4H, 4H), only (M, T) nonzero
    whh_t = params["w_hh"].T.astype(jnp.float32)
    w1_pad = jnp.zeros((H, W4), jnp.float32).at[:, :M].set(params["w1"].T)
    w2_pad = jnp.zeros((W4, W4), jnp.float32).at[:M, :T].set(params["w2"].T)
    packed_w = jnp.concatenate([whh_t, w1_pad, w2_pad],
                               axis=0).astype(jnp.bfloat16)        # (6H, 4H)

    # One f32 bias buffer: row 0 = b1 (zero-padded), row 1 = b2 (zero-padded).
    packed_b = (jnp.zeros((2, W4), jnp.float32)
                .at[0, :M].set(params["b1"])
                .at[1, :T].set(params["b2"]))

    return {"xg_table": xg_table, "packed_w": packed_w, "packed_b": packed_b}


@partial(jax.jit, static_argnames=("tagset_size",))
def rnn_acceptor_forward(data, prep, *, tagset_size):
    """data: (1, S) int token ids.  Returns (1, tagset_size) f32 logits."""
    S = data.shape[1]
    ids = data[0].astype(jnp.int32).reshape(S, 1)                 # (S, 1)

    vmem = pl.BlockSpec(memory_space=pltpu.MemorySpace.VMEM)
    out = pl.pallas_call(
        _rnn_acceptor_kernel,
        out_shape=jax.ShapeDtypeStruct((1, tagset_size), jnp.float32),
        in_specs=[vmem, vmem, vmem, vmem],
        out_specs=pl.BlockSpec(memory_space=pltpu.MemorySpace.VMEM),
    )(ids, prep["xg_table"], prep["packed_w"], prep["packed_b"])
    return out


def _reference_forward(data, params):
    """Pure-JAX f32 reference mirroring the PyTorch forward (for validation)."""
    emb = params["emb"][data[0]]                   # (S, E)
    H = params["w_hh"].shape[1]
    wih_t = params["w_ih"].T
    whh_t = params["w_hh"].T
    b = params["b_ih"] + params["b_hh"]

    def step(carry, x_t):
        h, c = carry
        gates = x_t @ wih_t + h @ whh_t + b
        i = jax.nn.sigmoid(gates[0 * H:1 * H])
        f = jax.nn.sigmoid(gates[1 * H:2 * H])
        g = jnp.tanh(gates[2 * H:3 * H])
        o = jax.nn.sigmoid(gates[3 * H:4 * H])
        c = f * c + i * g
        h = o * jnp.tanh(c)
        return (h, c), h

    (h_last, _), _ = lax.scan(step, (jnp.zeros(H), jnp.zeros(H)), emb)
    o1 = jnp.tanh(h_last @ params["w1"].T + params["b1"])
    o2 = o1 @ params["w2"].T + params["b2"]
    return o2[None, :]                             # (1, T)


def _init_params(key, vocab_size, embedding_dim, hidden_rnn_dim,
                 hidden_mlp_dim, tagset_size):
    ks = jax.random.split(key, 9)
    H = hidden_rnn_dim
    return {
        "emb":  0.1 * jax.random.normal(ks[0], (vocab_size, embedding_dim),
                                        jnp.float32),
        "w_ih": 0.1 * jax.random.normal(ks[1], (4 * H, embedding_dim),
                                        jnp.float32),
        "w_hh": 0.1 * jax.random.normal(ks[2], (4 * H, H), jnp.float32),
        "b_ih": 0.1 * jax.random.normal(ks[3], (4 * H,), jnp.float32),
        "b_hh": 0.1 * jax.random.normal(ks[4], (4 * H,), jnp.float32),
        "w1":   0.1 * jax.random.normal(ks[5], (hidden_mlp_dim, H), jnp.float32),
        "b1":   0.1 * jax.random.normal(ks[6], (hidden_mlp_dim,), jnp.float32),
        "w2":   0.1 * jax.random.normal(ks[7], (tagset_size, hidden_mlp_dim),
                                        jnp.float32),
        "b2":   0.1 * jax.random.normal(ks[8], (tagset_size,), jnp.float32),
    }


if __name__ == "__main__":
    vocab_size = 16
    embedding_dim = 32
    hidden_rnn_dim = 32
    hidden_mlp_dim = 32
    tagset_size = 8
    seq_len = 8

    key = jax.random.PRNGKey(0)
    pkey, dkey = jax.random.split(key)
    params = _init_params(pkey, vocab_size, embedding_dim, hidden_rnn_dim,
                          hidden_mlp_dim, tagset_size)
    prep = prepare_params(params)

    # data has PyTorch shape (1, seq_len): a single token-id sequence.
    data = jax.random.randint(dkey, (1, seq_len), 0, vocab_size, jnp.int32)

    out = rnn_acceptor_forward(data, prep, tagset_size=tagset_size)
    out = jax.block_until_ready(out)

    ref = _reference_forward(data, params)
    assert out.shape == (1, tagset_size), out.shape
    # bf16 MXU operands (f32 accumulation) loosen numerics slightly vs the
    # all-f32 reference; tolerance relaxed accordingly.
    assert jnp.allclose(out, ref, rtol=2e-2, atol=2e-2), (out, ref)

    print("KERNEL_OK")
</pallas_src>

<mosaic_0001>
module attributes {stable_mosaic.version = 11 : i64} {
  func.func @_rnn_acceptor_kernel(%arg0: memref<8x1xi32, #tpu.memory_space<vmem>>, %arg1: memref<16x128xf32, #tpu.memory_space<vmem>>, %arg2: memref<192x128xbf16, #tpu.memory_space<vmem>>, %arg3: memref<2x128xf32, #tpu.memory_space<vmem>>, %arg4: memref<1x8xf32, #tpu.memory_space<vmem>>) attributes {dimension_semantics = [], scalar_prefetch = 0 : i64, scratch_operands = 0 : i64, tpu.core_type = #tpu.core_type<tc>} {
    %c0 = arith.constant 0 : index
    %c0_0 = arith.constant 0 : index
    %0 = vector.load %arg0[%c0, %c0_0] : memref<8x1xi32, #tpu.memory_space<vmem>>, vector<8x1xi32>
    %1 = tpu.iota {dimensions = array<i32: 1>} : vector<8x16xi32>
    %2 = vector.broadcast %0 : vector<8x1xi32> to vector<8x16xi32>
    %3 = arith.cmpi eq, %1, %2 : vector<8x16xi32>
    %4 = arith.extui %3 : vector<8x16xi1> to vector<8x16xi32>
    %5 = arith.sitofp %4 : vector<8x16xi32> to vector<8x16xf32>
    %c0_1 = arith.constant 0 : index
    %c0_2 = arith.constant 0 : index
    %6 = vector.load %arg1[%c0_1, %c0_2] : memref<16x128xf32, #tpu.memory_space<vmem>>, vector<16x128xf32>
    %cst = arith.constant dense<0.000000e+00> : vector<8x128xf32>
    %7 = tpu.matmul %5, %6, %cst {dimension_numbers = #tpu.dot_dimension_numbers<[1], [0], [0], [1], [0, 0, 1, 1], [], []>} : vector<8x16xf32>, vector<16x128xf32>, vector<8x128xf32> -> vector<8x128xf32>
    %c0_3 = arith.constant 0 : index
    %c0_4 = arith.constant 0 : index
    %8 = vector.load %arg2[%c0_3, %c0_4] : memref<192x128xbf16, #tpu.memory_space<vmem>>, vector<32x128xbf16>
    %c32 = arith.constant 32 : index
    %c0_5 = arith.constant 0 : index
    %9 = vector.load %arg2[%c32, %c0_5] : memref<192x128xbf16, #tpu.memory_space<vmem>>, vector<32x128xbf16>
    %c64 = arith.constant 64 : index
    %c0_6 = arith.constant 0 : index
    %10 = vector.load %arg2[%c64, %c0_6] : memref<192x128xbf16, #tpu.memory_space<vmem>>, vector<128x128xbf16>
    %c0_7 = arith.constant 0 : index
    %c0_8 = arith.constant 0 : index
    %11 = vector.load %arg3[%c0_7, %c0_8] : memref<2x128xf32, #tpu.memory_space<vmem>>, vector<1x128xf32>
    %c1 = arith.constant 1 : index
    %c0_9 = arith.constant 0 : index
    %12 = vector.load %arg3[%c1, %c0_9] : memref<2x128xf32, #tpu.memory_space<vmem>>, vector<1x128xf32>
    %cst_10 = arith.constant 0.000000e+00 : f32
    %13 = vector.broadcast %cst_10 : f32 to vector<1x32xf32>
    %cst_11 = arith.constant 0.000000e+00 : f32
    %14 = vector.broadcast %cst_11 : f32 to vector<1x32xf32>
    %15 = vector.extract_strided_slice %7 {offsets = [0, 0], sizes = [1, 128], strides = [1, 1]} : vector<8x128xf32> to vector<1x128xf32>
    %16 = arith.truncf %13 : vector<1x32xf32> to vector<1x32xbf16>
    %cst_12 = arith.constant dense<0.000000e+00> : vector<1x128xf32>
    %17 = tpu.matmul %16, %8, %cst_12 {dimension_numbers = #tpu.dot_dimension_numbers<[1], [0], [0], [1], [0, 0, 1, 1], [], []>} : vector<1x32xbf16>, vector<32x128xbf16>, vector<1x128xf32> -> vector<1x128xf32>
    %18 = arith.addf %15, %17 : vector<1x128xf32>
    %19 = arith.negf %18 : vector<1x128xf32>
    %20 = math.exp %19 : vector<1x128xf32>
    %cst_13 = arith.constant 1.000000e+00 : f32
    %21 = vector.broadcast %cst_13 : f32 to vector<1x128xf32>
    %22 = arith.addf %21, %20 : vector<1x128xf32>
    %23 = arith.divf %21, %22 : vector<1x128xf32>
    %24 = math.tanh %18 : vector<1x128xf32>
    %25 = vector.extract_strided_slice %23 {offsets = [0, 0], sizes = [1, 32], strides = [1, 1]} : vector<1x128xf32> to vector<1x32xf32>
    %26 = vector.extract_strided_slice %23 {offsets = [0, 32], sizes = [1, 32], strides = [1, 1]} : vector<1x128xf32> to vector<1x32xf32>
    %27 = vector.extract_strided_slice %24 {offsets = [0, 64], sizes = [1, 32], strides = [1, 1]} : vector<1x128xf32> to vector<1x32xf32>
    %28 = vector.extract_strided_slice %23 {offsets = [0, 96], sizes = [1, 32], strides = [1, 1]} : vector<1x128xf32> to vector<1x32xf32>
    %29 = arith.mulf %26, %14 : vector<1x32xf32>
    %30 = arith.mulf %25, %27 : vector<1x32xf32>
    %31 = arith.addf %29, %30 : vector<1x32xf32>
    %32 = math.tanh %31 : vector<1x32xf32>
    %33 = arith.mulf %28, %32 : vector<1x32xf32>
    %34 = vector.extract_strided_slice %7 {offsets = [1, 0], sizes = [1, 128], strides = [1, 1]} : vector<8x128xf32> to vector<1x128xf32>
    %35 = arith.truncf %33 : vector<1x32xf32> to vector<1x32xbf16>
    %cst_14 = arith.constant dense<0.000000e+00> : vector<1x128xf32>
    %36 = tpu.matmul %35, %8, %cst_14 {dimension_numbers = #tpu.dot_dimension_numbers<[1], [0], [0], [1], [0, 0, 1, 1], [], []>} : vector<1x32xbf16>, vector<32x128xbf16>, vector<1x128xf32> -> vector<1x128xf32>
    %37 = arith.addf %34, %36 : vector<1x128xf32>
    %38 = arith.negf %37 : vector<1x128xf32>
    %39 = math.exp %38 : vector<1x128xf32>
    %cst_15 = arith.constant 1.000000e+00 : f32
    %40 = vector.broadcast %cst_15 : f32 to vector<1x128xf32>
    %41 = arith.addf %40, %39 : vector<1x128xf32>
    %42 = arith.divf %40, %41 : vector<1x128xf32>
    %43 = math.tanh %37 : vector<1x128xf32>
    %44 = vector.extract_strided_slice %42 {offsets = [0, 0], sizes = [1, 32], strides = [1, 1]} : vector<1x128xf32> to vector<1x32xf32>
    %45 = vector.extract_strided_slice %42 {offsets = [0, 32], sizes = [1, 32], strides = [1, 1]} : vector<1x128xf32> to vector<1x32xf32>
    %46 = vector.extract_strided_slice %43 {offsets = [0, 64], sizes = [1, 32], strides = [1, 1]} : vector<1x128xf32> to vector<1x32xf32>
    %47 = vector.extract_strided_slice %42 {offsets = [0, 96], sizes = [1, 32], strides = [1, 1]} : vector<1x128xf32> to vector<1x32xf32>
    %48 = arith.mulf %45, %31 : vector<1x32xf32>
    %49 = arith.mulf %44, %46 : vector<1x32xf32>
    %50 = arith.addf %48, %49 : vector<1x32xf32>
    %51 = math.tanh %50 : vector<1x32xf32>
    %52 = arith.mulf %47, %51 : vector<1x32xf32>
    %53 = vector.extract_strided_slice %7 {offsets = [2, 0], sizes = [1, 128], strides = [1, 1]} : vector<8x128xf32> to vector<1x128xf32>
    %54 = arith.truncf %52 : vector<1x32xf32> to vector<1x32xbf16>
    %cst_16 = arith.constant dense<0.000000e+00> : vector<1x128xf32>
    %55 = tpu.matmul %54, %8, %cst_16 {dimension_numbers = #tpu.dot_dimension_numbers<[1], [0], [0], [1], [0, 0, 1, 1], [], []>} : vector<1x32xbf16>, vector<32x128xbf16>, vector<1x128xf32> -> vector<1x128xf32>
    %56 = arith.addf %53, %55 : vector<1x128xf32>
    %57 = arith.negf %56 : vector<1x128xf32>
    %58 = math.exp %57 : vector<1x128xf32>
    %cst_17 = arith.constant 1.000000e+00 : f32
    %59 = vector.broadcast %cst_17 : f32 to vector<1x128xf32>
    %60 = arith.addf %59, %58 : vector<1x128xf32>
    %61 = arith.divf %59, %60 : vector<1x128xf32>
    %62 = math.tanh %56 : vector<1x128xf32>
    %63 = vector.extract_strided_slice %61 {offsets = [0, 0], sizes = [1, 32], strides = [1, 1]} : vector<1x128xf32> to vector<1x32xf32>
    %64 = vector.extract_strided_slice %61 {offsets = [0, 32], sizes = [1, 32], strides = [1, 1]} : vector<1x128xf32> to vector<1x32xf32>
    %65 = vector.extract_strided_slice %62 {offsets = [0, 64], sizes = [1, 32], strides = [1, 1]} : vector<1x128xf32> to vector<1x32xf32>
    %66 = vector.extract_strided_slice %61 {offsets = [0, 96], sizes = [1, 32], strides = [1, 1]} : vector<1x128xf32> to vector<1x32xf32>
    %67 = arith.mulf %64, %50 : vector<1x32xf32>
    %68 = arith.mulf %63, %65 : vector<1x32xf32>
    %69 = arith.addf %67, %68 : vector<1x32xf32>
    %70 = math.tanh %69 : vector<1x32xf32>
    %71 = arith.mulf %66, %70 : vector<1x32xf32>
    %72 = vector.extract_strided_slice %7 {offsets = [3, 0], sizes = [1, 128], strides = [1, 1]} : vector<8x128xf32> to vector<1x128xf32>
    %73 = arith.truncf %71 : vector<1x32xf32> to vector<1x32xbf16>
    %cst_18 = arith.constant dense<0.000000e+00> : vector<1x128xf32>
    %74 = tpu.matmul %73, %8, %cst_18 {dimension_numbers = #tpu.dot_dimension_numbers<[1], [0], [0], [1], [0, 0, 1, 1], [], []>} : vector<1x32xbf16>, vector<32x128xbf16>, vector<1x128xf32> -> vector<1x128xf32>
    %75 = arith.addf %72, %74 : vector<1x128xf32>
    %76 = arith.negf %75 : vector<1x128xf32>
    %77 = math.exp %76 : vector<1x128xf32>
    %cst_19 = arith.constant 1.000000e+00 : f32
    %78 = vector.broadcast %cst_19 : f32 to vector<1x128xf32>
    %79 = arith.addf %78, %77 : vector<1x128xf32>
    %80 = arith.divf %78, %79 : vector<1x128xf32>
    %81 = math.tanh %75 : vector<1x128xf32>
    %82 = vector.extract_strided_slice %80 {offsets = [0, 0], sizes = [1, 32], strides = [1, 1]} : vector<1x128xf32> to vector<1x32xf32>
    %83 = vector.extract_strided_slice %80 {offsets = [0, 32], sizes = [1, 32], strides = [1, 1]} : vector<1x128xf32> to vector<1x32xf32>
    %84 = vector.extract_strided_slice %81 {offsets = [0, 64], sizes = [1, 32], strides = [1, 1]} : vector<1x128xf32> to vector<1x32xf32>
    %85 = vector.extract_strided_slice %80 {offsets = [0, 96], sizes = [1, 32], strides = [1, 1]} : vector<1x128xf32> to vector<1x32xf32>
    %86 = arith.mulf %83, %69 : vector<1x32xf32>
    %87 = arith.mulf %82, %84 : vector<1x32xf32>
    %88 = arith.addf %86, %87 : vector<1x32xf32>
    %89 = math.tanh %88 : vector<1x32xf32>
    %90 = arith.mulf %85, %89 : vector<1x32xf32>
    %91 = vector.extract_strided_slice %7 {offsets = [4, 0], sizes = [1, 128], strides = [1, 1]} : vector<8x128xf32> to vector<1x128xf32>
    %92 = arith.truncf %90 : vector<1x32xf32> to vector<1x32xbf16>
    %cst_20 = arith.constant dense<0.000000e+00> : vector<1x128xf32>
    %93 = tpu.matmul %92, %8, %cst_20 {dimension_numbers = #tpu.dot_dimension_numbers<[1], [0], [0], [1], [0, 0, 1, 1], [], []>} : vector<1x32xbf16>, vector<32x128xbf16>, vector<1x128xf32> -> vector<1x128xf32>
    %94 = arith.addf %91, %93 : vector<1x128xf32>
    %95 = arith.negf %94 : vector<1x128xf32>
    %96 = math.exp %95 : vector<1x128xf32>
    %cst_21 = arith.constant 1.000000e+00 : f32
    %97 = vector.broadcast %cst_21 : f32 to vector<1x128xf32>
    %98 = arith.addf %97, %96 : vector<1x128xf32>
    %99 = arith.divf %97, %98 : vector<1x128xf32>
    %100 = math.tanh %94 : vector<1x128xf32>
    %101 = vector.extract_strided_slice %99 {offsets = [0, 0], sizes = [1, 32], strides = [1, 1]} : vector<1x128xf32> to vector<1x32xf32>
    %102 = vector.extract_strided_slice %99 {offsets = [0, 32], sizes = [1, 32], strides = [1, 1]} : vector<1x128xf32> to vector<1x32xf32>
    %103 = vector.extract_strided_slice %100 {offsets = [0, 64], sizes = [1, 32], strides = [1, 1]} : vector<1x128xf32> to vector<1x32xf32>
    %104 = vector.extract_strided_slice %99 {offsets = [0, 96], sizes = [1, 32], strides = [1, 1]} : vector<1x128xf32> to vector<1x32xf32>
    %105 = arith.mulf %102, %88 : vector<1x32xf32>
    %106 = arith.mulf %101, %103 : vector<1x32xf32>
    %107 = arith.addf %105, %106 : vector<1x32xf32>
    %108 = math.tanh %107 : vector<1x32xf32>
    %109 = arith.mulf %104, %108 : vector<1x32xf32>
    %110 = vector.extract_strided_slice %7 {offsets = [5, 0], sizes = [1, 128], strides = [1, 1]} : vector<8x128xf32> to vector<1x128xf32>
    %111 = arith.truncf %109 : vector<1x32xf32> to vector<1x32xbf16>
    %cst_22 = arith.constant dense<0.000000e+00> : vector<1x128xf32>
    %112 = tpu.matmul %111, %8, %cst_22 {dimension_numbers = #tpu.dot_dimension_numbers<[1], [0], [0], [1], [0, 0, 1, 1], [], []>} : vector<1x32xbf16>, vector<32x128xbf16>, vector<1x128xf32> -> vector<1x128xf32>
    %113 = arith.addf %110, %112 : vector<1x128xf32>
    %114 = arith.negf %113 : vector<1x128xf32>
    %115 = math.exp %114 : vector<1x128xf32>
    %cst_23 = arith.constant 1.000000e+00 : f32
    %116 = vector.broadcast %cst_23 : f32 to vector<1x128xf32>
    %117 = arith.addf %116, %115 : vector<1x128xf32>
    %118 = arith.divf %116, %117 : vector<1x128xf32>
    %119 = math.tanh %113 : vector<1x128xf32>
    %120 = vector.extract_strided_slice %118 {offsets = [0, 0], sizes = [1, 32], strides = [1, 1]} : vector<1x128xf32> to vector<1x32xf32>
    %121 = vector.extract_strided_slice %118 {offsets = [0, 32], sizes = [1, 32], strides = [1, 1]} : vector<1x128xf32> to vector<1x32xf32>
    %122 = vector.extract_strided_slice %119 {offsets = [0, 64], sizes = [1, 32], strides = [1, 1]} : vector<1x128xf32> to vector<1x32xf32>
    %123 = vector.extract_strided_slice %118 {offsets = [0, 96], sizes = [1, 32], strides = [1, 1]} : vector<1x128xf32> to vector<1x32xf32>
    %124 = arith.mulf %121, %107 : vector<1x32xf32>
    %125 = arith.mulf %120, %122 : vector<1x32xf32>
    %126 = arith.addf %124, %125 : vector<1x32xf32>
    %127 = math.tanh %126 : vector<1x32xf32>
    %128 = arith.mulf %123, %127 : vector<1x32xf32>
    %129 = vector.extract_strided_slice %7 {offsets = [6, 0], sizes = [1, 128], strides = [1, 1]} : vector<8x128xf32> to vector<1x128xf32>
    %130 = arith.truncf %128 : vector<1x32xf32> to vector<1x32xbf16>
    %cst_24 = arith.constant dense<0.000000e+00> : vector<1x128xf32>
    %131 = tpu.matmul %130, %8, %cst_24 {dimension_numbers = #tpu.dot_dimension_numbers<[1], [0], [0], [1], [0, 0, 1, 1], [], []>} : vector<1x32xbf16>, vector<32x128xbf16>, vector<1x128xf32> -> vector<1x128xf32>
    %132 = arith.addf %129, %131 : vector<1x128xf32>
    %133 = arith.negf %132 : vector<1x128xf32>
    %134 = math.exp %133 : vector<1x128xf32>
    %cst_25 = arith.constant 1.000000e+00 : f32
    %135 = vector.broadcast %cst_25 : f32 to vector<1x128xf32>
    %136 = arith.addf %135, %134 : vector<1x128xf32>
    %137 = arith.divf %135, %136 : vector<1x128xf32>
    %138 = math.tanh %132 : vector<1x128xf32>
    %139 = vector.extract_strided_slice %137 {offsets = [0, 0], sizes = [1, 32], strides = [1, 1]} : vector<1x128xf32> to vector<1x32xf32>
    %140 = vector.extract_strided_slice %137 {offsets = [0, 32], sizes = [1, 32], strides = [1, 1]} : vector<1x128xf32> to vector<1x32xf32>
    %141 = vector.extract_strided_slice %138 {offsets = [0, 64], sizes = [1, 32], strides = [1, 1]} : vector<1x128xf32> to vector<1x32xf32>
    %142 = vector.extract_strided_slice %137 {offsets = [0, 96], sizes = [1, 32], strides = [1, 1]} : vector<1x128xf32> to vector<1x32xf32>
    %143 = arith.mulf %140, %126 : vector<1x32xf32>
    %144 = arith.mulf %139, %141 : vector<1x32xf32>
    %145 = arith.addf %143, %144 : vector<1x32xf32>
    %146 = math.tanh %145 : vector<1x32xf32>
    %147 = arith.mulf %142, %146 : vector<1x32xf32>
    %148 = vector.extract_strided_slice %7 {offsets = [7, 0], sizes = [1, 128], strides = [1, 1]} : vector<8x128xf32> to vector<1x128xf32>
    %149 = arith.truncf %147 : vector<1x32xf32> to vector<1x32xbf16>
    %cst_26 = arith.constant dense<0.000000e+00> : vector<1x128xf32>
    %150 = tpu.matmul %149, %8, %cst_26 {dimension_numbers = #tpu.dot_dimension_numbers<[1], [0], [0], [1], [0, 0, 1, 1], [], []>} : vector<1x32xbf16>, vector<32x128xbf16>, vector<1x128xf32> -> vector<1x128xf32>
    %151 = arith.addf %148, %150 : vector<1x128xf32>
    %152 = arith.negf %151 : vector<1x128xf32>
    %153 = math.exp %152 : vector<1x128xf32>
    %cst_27 = arith.constant 1.000000e+00 : f32
    %154 = vector.broadcast %cst_27 : f32 to vector<1x128xf32>
    %155 = arith.addf %154, %153 : vector<1x128xf32>
    %156 = arith.divf %154, %155 : vector<1x128xf32>
    %157 = math.tanh %151 : vector<1x128xf32>
    %158 = vector.extract_strided_slice %156 {offsets = [0, 0], sizes = [1, 32], strides = [1, 1]} : vector<1x128xf32> to vector<1x32xf32>
    %159 = vector.extract_strided_slice %156 {offsets = [0, 32], sizes = [1, 32], strides = [1, 1]} : vector<1x128xf32> to vector<1x32xf32>
    %160 = vector.extract_strided_slice %157 {offsets = [0, 64], sizes = [1, 32], strides = [1, 1]} : vector<1x128xf32> to vector<1x32xf32>
    %161 = vector.extract_strided_slice %156 {offsets = [0, 96], sizes = [1, 32], strides = [1, 1]} : vector<1x128xf32> to vector<1x32xf32>
    %162 = arith.mulf %159, %145 : vector<1x32xf32>
    %163 = arith.mulf %158, %160 : vector<1x32xf32>
    %164 = arith.addf %162, %163 : vector<1x32xf32>
    %165 = math.tanh %164 : vector<1x32xf32>
    %166 = arith.mulf %161, %165 : vector<1x32xf32>
    %167 = arith.truncf %166 : vector<1x32xf32> to vector<1x32xbf16>
    %cst_28 = arith.constant dense<0.000000e+00> : vector<1x128xf32>
    %168 = tpu.matmul %167, %9, %cst_28 {dimension_numbers = #tpu.dot_dimension_numbers<[1], [0], [0], [1], [0, 0, 1, 1], [], []>} : vector<1x32xbf16>, vector<32x128xbf16>, vector<1x128xf32> -> vector<1x128xf32>
    %169 = arith.addf %168, %11 : vector<1x128xf32>
    %170 = math.tanh %169 : vector<1x128xf32>
    %171 = arith.truncf %170 : vector<1x128xf32> to vector<1x128xbf16>
    %cst_29 = arith.constant dense<0.000000e+00> : vector<1x128xf32>
    %172 = tpu.matmul %171, %10, %cst_29 {dimension_numbers = #tpu.dot_dimension_numbers<[1], [0], [0], [1], [0, 0, 1, 1], [], []>} : vector<1x128xbf16>, vector<128x128xbf16>, vector<1x128xf32> -> vector<1x128xf32>
    %173 = arith.addf %172, %12 : vector<1x128xf32>
    %174 = vector.extract_strided_slice %173 {offsets = [0, 0], sizes = [1, 8], strides = [1, 1]} : vector<1x128xf32> to vector<1x8xf32>
    %c0_30 = arith.constant 0 : index
    %c0_31 = arith.constant 0 : index
    %175 = vector.load %arg4[%c0_30, %c0_31] : memref<1x8xf32, #tpu.memory_space<vmem>>, vector<1x8xf32>
    tpu.vector_store %arg4[%c0_30, %c0_31], %174 {strides = array<i32>} : memref<1x8xf32, #tpu.memory_space<vmem>>, vector<1x8xf32>,
    return
  }
}

</mosaic_0001>

<bundles_post_ra>
// kernel: rnn_acceptor_forward.1
= control target key start
LH: loop header
LB: loop body
LE: loop exit
PB: predicated region body
PF: predicated region fallthrough
CT: control target
= control target key end

     0   :  { %9 = vsyncpa [#allocation3], 0  ;;  %s1461_s0 = inlined_call_operand.vmem [shape: s32[8,1], index: 0, kind: input, shape index: {}]   ;;  %s1462_s1 = inlined_call_operand.vmem [shape: f32[16,128], index: 1, kind: input, shape index: {}]   ;;  %s1463_s2 = inlined_call_operand.hbm [shape: bf16[192,128], index: 2, kind: input, shape index: {}]   ;;  %s1464_s3 = inlined_call_operand.hbm [shape: f32[2,128], index: 3, kind: input, shape index: {}]   ;;  %s1465_s4 = inlined_call_operand.hbm [shape: f32[1,8], index: 4, kind: output, shape index: {}]  }
   0x1   :  { %10 = vsyncpa [#allocation6], 0 }
   0x2   :  { %11 = vsyncpa [#allocation4], 0  ;;  %s1286_s15 = smov [#allocation2]  }
   0x3   :  { %s21_s16 = sshll.u32 %s1286_s15, 4  ;;  %s22_s16 = int_to_ptr.vmem [resolvable:$true] %s21_s16 }
   0x4   :  { %s1228_s17 = scalar_lea.vmem %s22_s16, 1536  ;;  %p1233_p1 = scmp.lt.s32.totalorder %s22_s16, %s22_s16 }
   0x5   :  { %p1229_p0 = scmp.ne.s32.totalorder %s22_s16, %s1228_s17  ;;  %p1234_p2 = scmp.lt.s32.totalorder %s1228_s17, %s1228_s17 }
   0x7   :  { %p1235_p3 = por %p1234_p2, %p1233_p1 }
   0x9   :  { %p1236_p4 = pnand %p1235_p3, %p1229_p0 }
   0xb   :  { %1239 = shalt.err (!%p1236_p4)
}
   0xc   :  { %s1287_s18 = smov 64   ;;  %s1288_s19 = smov 4  }
   0xd   :  { %27 = dma.hbm_to_vmem [thread:$0]  %s1463_s2, 1536, %s22_s16, [#allocation3], %s1287_s18, %s1287_s18, %s1288_s19  }
   0xe   :  { %s1289_s22 = smov [#allocation5]  }
   0xf   :  { %s34_s23 = sshll.u32 %s1289_s22, 4  ;;  %s35_s23 = int_to_ptr.vmem [resolvable:$true] %s34_s23 }
  0x10   :  { %s1248_s24 = scalar_lea.vmem %s35_s23, 32  ;;  %p1253_p6 = scmp.lt.s32.totalorder %s35_s23, %s35_s23 }
  0x11   :  { %p1249_p5 = scmp.ne.s32.totalorder %s35_s23, %s1248_s24  ;;  %p1254_p7 = scmp.lt.s32.totalorder %s1248_s24, %s1248_s24 }
  0x13   :  { %p1255_p8 = por %p1254_p7, %p1253_p6 }
  0x15   :  { %p1256_p9 = pnand %p1255_p8, %p1249_p5 }
  0x17   :  { %1259 = shalt.err (!%p1256_p9)
}
  0x18   :  { %37 = dma.hbm_to_vmem [thread:$0]  %s1464_s3, 32, %s35_s23, [#allocation6]  }
  0x19   :  { %1280 = dma.done.wait [#allocation3], 1536  }
  0x1a   :  { %1281 = vsyncadd [#allocation3], 4294965760 }
  0x1b   :  { %1282 = dma.done.wait [#allocation6], 32  }
  0x1c   :  { %1283 = vsyncadd [#allocation6], 4294967264  ;;  %v1290_v0 = vmov 0   ;;  %v1291_v1 = vmov 0.0   ;;  %vm1292_vm0 = vmmov 0   ;;  %v45_v2 = vld [vmem:[%s1461_s0] sm:$0xff]  ;;  %v46_v7 = vlaneseq }
  0x1d   :  { %1141 = vset.pattern.permute.xlu0 %v1290_v0  ;;  %1033 = vmatprep.subr.mxu1 %v1291_v1  ;;  %v55_v3 = vld [vmem:[%s1462_s1 + $0x8] sm:$0xff]  ;;  %v54_v4 = vld [vmem:[%s1462_s1] sm:$0xff]  ;;  %vm56_vm1 = vcmask 130048   ;;  %s1293_s0 = smov 32   ;;  %vm168_vm3 = vcmask 261120   ;;  %s1294_s1 = smov [#allocation7]  }
  0x1e   :  { %1064 = vmatprep.subr.bf16.mxu0 %v1291_v1  ;;  %1037 = vmatprep.mubr.msk.f32.mxu1 %vm1292_vm0, %v1291_v1  ;;  %v1343_v5 = vld [vmem:[#allocation2 + $0x8] sm:$0xff]   ;;  %v1346_v6 = vld [vmem:[#allocation2] sm:$0xff]   ;;  %v47_v8 = vand.u32 127, %v46_v7  ;;  %s954_s5 = sshll.u32 %s1294_s1, 4  ;;  %vm946_vm4 = vcmask 57344   ;;  %s955_s5 = int_to_ptr.vmem [resolvable:$true] %s954_s5 }
  0x1f   :  { %1068 = vmatprep.mubr.msk.bf16.mxu0 %vm1292_vm0, %v1291_v1  ;;  %49 = vperm.xlu0 %1141, %v45_v2   ;;  %s1260_s6 = scalar_lea.vmem %s955_s5, 16  ;;  %s1264_s7 = scalar_lea.vmem %s955_s5, 32 }
  0x20   :  { %1034 = vmatpush3.msra.mxu1 %v55_v3  ;;  %1065 = vmatpush3.bf16.msra.mxu0 %v1343_v5  ;;  %p1261_p10 = scmp.ne.s32.totalorder %s955_s5, %s1260_s6  ;;  %p1265_p11 = scmp.lt.s32.totalorder %s955_s5, %s955_s5 }
  0x21   :  { %1035 = vmatprep.subr.mxu1 %v1291_v1  ;;  %1066 = vmatprep.subr.bf16.mxu0 %v1291_v1  ;;  %p1266_p12 = scmp.lt.s32.totalorder %s1264_s7, %s1260_s6 }
  0x22   :  { %1036 = vmatpush3.msra.mxu1 %v54_v4 }
  0x23   :  { %1040 = vmatprep.subr.bf16.mxu1 %v1291_v1  ;;  %p1267_p13 = por %p1266_p12, %p1265_p11 }
  0x24   :  { %1067 = vmatpush3.bf16.msra.mxu0 %v1346_v6 }
  0x25   :  { %1080 = vmatprep.subr.bf16.mxu0 %v1291_v1  ;;  %p1268_p0 = pnand %p1267_p13, %p1261_p10 }
  0x9a   :  { %v50_v9 = vpop.permute.xlu0 %49 }
  0x9b   :  { %vm51_vm2 = vcmp.eq.s32.totalorder %v47_v8, %v50_v9 }
  0x9c   :  { %v964_v10 = vsel %vm51_vm2, 1.0, %v1291_v1 }
  0x9d   :  { %1038 = vmatmul.mubr.msk.f32.vlgmr.msra.gmra.mxu1 %vm56_vm1, %v964_v10 }
  0x9e   :  { %1041 = vmatpush3.bf16.msra.mxu1 %v1343_v5  ;;  %1044 = vmatprep.mubr.msk.bf16.mxu1 %vm1292_vm0, %v1291_v1 }
  0x9f   :  { %1042 = vmatprep.subr.bf16.mxu1 %v1291_v1 }
  0xa2   :  { %1043 = vmatpush3.bf16.msra.mxu1 %v1346_v6 }
  0xa3   :  { %1048 = vmatprep.subr.bf16.mxu1 %v1291_v1 }
  0xa5   :  { %1045 = vmatmul.mubr.bf16.vlgmr.msra.gmra.mxu1 %v1290_v0 }
  0xa6   :  { %1049 = vmatpush3.bf16.msra.mxu1 %v1343_v5  ;;  %1052 = vmatprep.mubr.msk.bf16.mxu1 %vm1292_vm0, %v1291_v1 }
  0xa7   :  { %1050 = vmatprep.subr.bf16.mxu1 %v1291_v1 }
  0xaa   :  { %1051 = vmatpush3.bf16.msra.mxu1 %v1346_v6 }
  0xab   :  { %1056 = vmatprep.subr.bf16.mxu1 %v1291_v1 }
 0x15d   :  { %v1366_v11 = vpop.f32.mrf.mxu1 }
 0x15f   :  { %v1039_v12 = vpop.f32.mrf.mxu1 }
 0x165   :  { %v206_v13 = vpop.f32.mrf.mxu1 }
 0x166   :  { %v212_v14 = vadd.f32 %v206_v13, %v1366_v11 }
 0x167   :  { %v1046_v15 = vpop.f32.mrf.mxu1 }
 0x168   :  { %1154 = vtanh.f32 %v212_v14  ;;  %v968_v19 = vmul.f32 -1.442695, %v212_v14 }
 0x169   :  { %v209_v16 = vpop.f32.mrf.mxu1 }
 0x16a   :  { %1156 = vpow2.f32 %v968_v19 }
 0x16b   :  { %v1047_v17 = vpop.f32.mrf.mxu1 }
 0x175   :  { %v1155_v18 = vpop.eup %1154 }
 0x176   :  { %222 = vrot.lane.b32.xlu0 %v1155_v18, %s1287_s18 }
 0x177   :  { %v1157_v20 = vpop.eup %1156 }
 0x178   :  { %v216_v21 = vadd.f32 1.0, %v1157_v20 }
 0x17a   :  { %1158 = vrcp.f32 %v216_v21 }
 0x187   :  { %v1159_v22 = vpop.eup %1158 }
 0x188   :  { %v220_v25 = vmul.f32 0.0, %v1159_v22 }
 0x1e8   :  { %v223_v23 = vpop.permute.xlu0 %222 }
 0x1e9   :  { %v225_v24 = vmul.f32 %v1159_v22, %v223_v23 }
 0x1eb   :  { %227 = vrot.lane.b32.xlu1 %v225_v24, %s1293_s0 }
 0x25d   :  { %v228_v26 = vpop.permute.xlu1 %227 }
 0x25e   :  { %v230_v27 = vadd.f32 %v228_v26, %v220_v25 }
 0x260   :  { %1160 = vtanh.f32 %v230_v27  ;;  %v296_v46 = vrot.slane %v230_v27, 7 }
 0x26d   :  { %v1161_v28 = vpop.eup %1160 }
 0x26e   :  { %233 = vrot.lane.b32.xlu1 %v1161_v28, %s1287_s18 }
 0x2e0   :  { %v234_v29 = vpop.permute.xlu1 %233 }
 0x2e1   :  { %v236_v30 = vmul.f32 %v1159_v22, %v234_v29 }
 0x2e3   :  { %v237_v31 = vpack.c.bf16 %v236_v30, %v236_v30 }
 0x2e5   :  { %239 = vrot.lane.b32.xlu0 %v237_v31, %s1293_s0 }
 0x357   :  { %v240_v32 = vpop.permute.xlu0 %239 }
 0x358   :  { %1053 = vmatmul.mubr.msk.bf16.vlgmr.msra.gmra.mxu1 %vm168_vm3, %v240_v32 }
 0x359   :  { %1057 = vmatpush3.bf16.msra.mxu1 %v1343_v5  ;;  %1060 = vmatprep.mubr.msk.bf16.mxu1 %vm1292_vm0, %v1291_v1 }
 0x35a   :  { %1058 = vmatprep.subr.bf16.mxu1 %v1291_v1 }
 0x35d   :  { %1059 = vmatpush3.bf16.msra.mxu1 %v1346_v6 }
 0x35e   :  { %1072 = vmatprep.subr.bf16.mxu1 %v1291_v1 }
 0x418   :  { %v278_v33 = vpop.f32.mrf.mxu1 }
 0x419   :  { %v285_v34 = vrot.slane %v278_v33, 7 }
 0x41a   :  { %v1054_v35 = vpop.f32.mrf.mxu1 }
 0x41b   :  { %v287_v36 = vadd.f32 %v285_v34, %v1366_v11 }
 0x41c   :  { %v281_v37 = vpop.f32.mrf.mxu1 }
 0x41d   :  { %1162 = vtanh.f32 %v287_v36  ;;  %v970_v40 = vmul.f32 -1.442695, %v287_v36 }
 0x41e   :  { %v1055_v38 = vpop.f32.mrf.mxu1 }
 0x41f   :  { %1164 = vpow2.f32 %v970_v40 }
 0x42a   :  { %v1163_v39 = vpop.eup %1162 }
 0x42b   :  { %300 = vrot.lane.b32.xlu1 %v1163_v39, %s1287_s18 }
 0x42c   :  { %v1165_v41 = vpop.eup %1164 }
 0x42d   :  { %v291_v42 = vadd.f32 1.0, %v1165_v41 }
 0x42f   :  { %1166 = vrcp.f32 %v291_v42 }
 0x43c   :  { %v1167_v43 = vpop.eup %1166 }
 0x43d   :  { %v298_v47 = vmul.f32 %v1167_v43, %v296_v46 }
 0x49d   :  { %v301_v44 = vpop.permute.xlu1 %300 }
 0x49e   :  { %v303_v45 = vmul.f32 %v1167_v43, %v301_v44 }
 0x4a0   :  { %305 = vrot.lane.b32.xlu0 %v303_v45, %s1293_s0 }
 0x512   :  { %v306_v48 = vpop.permute.xlu0 %305 }
 0x513   :  { %v308_v49 = vadd.f32 %v306_v48, %v298_v47 }
 0x515   :  { %1168 = vtanh.f32 %v308_v49  ;;  %v376_v8 = vrot.slane %v308_v49, 7 }
 0x522   :  { %v1169_v50 = vpop.eup %1168 }
 0x523   :  { %311 = vrot.lane.b32.xlu1 %v1169_v50, %s1287_s18 }
 0x595   :  { %v312_v51 = vpop.permute.xlu1 %311 }
 0x596   :  { %v314_v52 = vmul.f32 %v1167_v43, %v312_v51 }
 0x598   :  { %v315_v53 = vpack.c.bf16 %v314_v52, %v314_v52 }
 0x59a   :  { %v317_v54 = vshrl.u32 %v315_v53, 16 }
 0x59c   :  { %319 = vrot.lane.b32.xlu0 %v317_v54, %s1293_s0 }
 0x60e   :  { %v320_v55 = vpop.permute.xlu0 %319 }
 0x60f   :  { %1061 = vmatmul.mubr.msk.bf16.vlgmr.msra.gmra.mxu1 %vm168_vm3, %v320_v55 }
 0x610   :  { %1073 = vmatpush3.bf16.msra.mxu1 %v1343_v5  ;;  %1076 = vmatprep.mubr.msk.bf16.mxu1 %vm1292_vm0, %v1291_v1 }
 0x611   :  { %1074 = vmatprep.subr.bf16.mxu1 %v1291_v1 }
 0x614   :  { %1075 = vmatpush3.bf16.msra.mxu1 %v1346_v6 }
 0x615   :  { %1088 = vmatprep.subr.bf16.mxu1 %v1291_v1 }
 0x6cf   :  { %v358_v56 = vpop.f32.mrf.mxu1 }
 0x6d0   :  { %v365_v57 = vrot.slane %v358_v56, 6 }
 0x6d1   :  { %v1062_v58 = vpop.f32.mrf.mxu1 }
 0x6d2   :  { %v367_v59 = vadd.f32 %v365_v57, %v1366_v11 }
 0x6d3   :  { %v361_v60 = vpop.f32.mrf.mxu1 }
 0x6d4   :  { %1170 = vtanh.f32 %v367_v59  ;;  %v972_v63 = vmul.f32 -1.442695, %v367_v59 }
 0x6d5   :  { %v1063_v61 = vpop.f32.mrf.mxu1 }
 0x6d6   :  { %1172 = vpow2.f32 %v972_v63 }
 0x6e1   :  { %v1171_v62 = vpop.eup %1170 }
 0x6e2   :  { %380 = vrot.lane.b32.xlu1 %v1171_v62, %s1287_s18 }
 0x6e3   :  { %v1173_v0 = vpop.eup %1172 }
 0x6e4   :  { %v371_v2 = vadd.f32 1.0, %v1173_v0 }
 0x6e6   :  { %1174 = vrcp.f32 %v371_v2 }
 0x6f3   :  { %v1175_v3 = vpop.eup %1174 }
 0x6f4   :  { %v378_v9 = vmul.f32 %v1175_v3, %v376_v8 }
 0x754   :  { %v381_v4 = vpop.permute.xlu1 %380 }
 0x755   :  { %v383_v7 = vmul.f32 %v1175_v3, %v381_v4 }
 0x757   :  { %385 = vrot.lane.b32.xlu0 %v383_v7, %s1293_s0 }
 0x7c9   :  { %v386_v10 = vpop.permute.xlu0 %385 }
 0x7ca   :  { %v388_v12 = vadd.f32 %v386_v10, %v378_v9 }
 0x7cc   :  { %1176 = vtanh.f32 %v388_v12  ;;  %v455_v32 = vrot.slane %v388_v12, 7 }
 0x7d9   :  { %v1177_v13 = vpop.eup %1176 }
 0x7da   :  { %391 = vrot.lane.b32.xlu1 %v1177_v13, %s1287_s18 }
 0x84c   :  { %v392_v14 = vpop.permute.xlu1 %391 }
 0x84d   :  { %v394_v15 = vmul.f32 %v1175_v3, %v392_v14 }
 0x84f   :  { %v395_v16 = vpack.c.bf16 %v394_v15, %v394_v15 }
 0x851   :  { %v397_v17 = vrot.slane %v395_v16, 1 }
 0x853   :  { %398 = vrot.lane.b32.xlu0 %v397_v17, %s1293_s0 }
 0x8c5   :  { %v399_v18 = vpop.permute.xlu0 %398 }
 0x8c6   :  { %1069 = vmatmul.mubr.msk.bf16.vlgmr.msra.gmra.mxu0 %vm168_vm3, %v399_v18 }
 0x8c7   :  { %1081 = vmatpush3.bf16.msra.mxu0 %v1343_v5  ;;  %1084 = vmatprep.mubr.msk.bf16.mxu0 %vm1292_vm0, %v1291_v1 }
 0x8c8   :  { %1082 = vmatprep.subr.bf16.mxu0 %v1291_v1 }
 0x8cb   :  { %1083 = vmatpush3.bf16.msra.mxu0 %v1346_v6 }
 0x8cc   :  { %1096 = vmatprep.subr.bf16.mxu0 %v1291_v1 }
 0x986   :  { %v437_v19 = vpop.f32.mrf.mxu0 }
 0x987   :  { %v444_v20 = vrot.slane %v437_v19, 5 }
 0x988   :  { %v1070_v21 = vpop.f32.mrf.mxu0 }
 0x989   :  { %v446_v22 = vadd.f32 %v444_v20, %v1366_v11 }
 0x98a   :  { %v440_v23 = vpop.f32.mrf.mxu0 }
 0x98b   :  { %1178 = vtanh.f32 %v446_v22  ;;  %v974_v26 = vmul.f32 -1.442695, %v446_v22 }
 0x98c   :  { %v1071_v24 = vpop.f32.mrf.mxu0 }
 0x98d   :  { %1180 = vpow2.f32 %v974_v26 }
 0x998   :  { %v1179_v25 = vpop.eup %1178 }
 0x999   :  { %459 = vrot.lane.b32.xlu1 %v1179_v25, %s1287_s18 }
 0x99a   :  { %v1181_v27 = vpop.eup %1180 }
 0x99b   :  { %v450_v28 = vadd.f32 1.0, %v1181_v27 }
 0x99d   :  { %1182 = vrcp.f32 %v450_v28 }
 0x9aa   :  { %v1183_v29 = vpop.eup %1182 }
 0x9ab   :  { %v457_v33 = vmul.f32 %v1183_v29, %v455_v32 }
 0xa0b   :  { %v460_v30 = vpop.permute.xlu1 %459 }
 0xa0c   :  { %v462_v31 = vmul.f32 %v1183_v29, %v460_v30 }
 0xa0e   :  { %464 = vrot.lane.b32.xlu0 %v462_v31, %s1293_s0 }
 0xa80   :  { %v465_v34 = vpop.permute.xlu0 %464 }
 0xa81   :  { %v467_v35 = vadd.f32 %v465_v34, %v457_v33 }
 0xa83   :  { %1184 = vtanh.f32 %v467_v35  ;;  %v536_v56 = vrot.slane %v467_v35, 7 }
 0xa90   :  { %v1185_v36 = vpop.eup %1184 }
 0xa91   :  { %470 = vrot.lane.b32.xlu1 %v1185_v36, %s1287_s18 }
 0xb03   :  { %v471_v37 = vpop.permute.xlu1 %470 }
 0xb04   :  { %v473_v38 = vmul.f32 %v1183_v29, %v471_v37 }
 0xb06   :  { %v474_v39 = vpack.c.bf16 %v473_v38, %v473_v38 }
 0xb08   :  { %v476_v40 = vshrl.u32 %v474_v39, 16 }
 0xb0a   :  { %v478_v41 = vrot.slane %v476_v40, 1 }
 0xb0c   :  { %479 = vrot.lane.b32.xlu0 %v478_v41, %s1293_s0 }
 0xb7e   :  { %v480_v42 = vpop.permute.xlu0 %479 }
 0xb7f   :  { %1077 = vmatmul.mubr.msk.bf16.vlgmr.msra.gmra.mxu1 %vm168_vm3, %v480_v42 }
 0xb80   :  { %1089 = vmatpush3.bf16.msra.mxu1 %v1343_v5  ;;  %1092 = vmatprep.mubr.msk.bf16.mxu1 %vm1292_vm0, %v1291_v1 }
 0xb81   :  { %1090 = vmatprep.subr.bf16.mxu1 %v1291_v1 }
 0xb84   :  { %1091 = vmatpush3.bf16.msra.mxu1 %v1346_v6 }
 0xb85   :  { %1104 = vmatprep.subr.bf16.mxu1 %v1291_v1 }
 0xc3f   :  { %v518_v43 = vpop.f32.mrf.mxu1 }
 0xc40   :  { %v525_v44 = vrot.slane %v518_v43, 4 }
 0xc41   :  { %v1078_v45 = vpop.f32.mrf.mxu1 }
 0xc42   :  { %v527_v46 = vadd.f32 %v525_v44, %v1366_v11 }
 0xc43   :  { %v521_v47 = vpop.f32.mrf.mxu1 }
 0xc44   :  { %1186 = vtanh.f32 %v527_v46  ;;  %v976_v50 = vmul.f32 -1.442695, %v527_v46 }
 0xc45   :  { %v1079_v48 = vpop.f32.mrf.mxu1 }
 0xc46   :  { %1188 = vpow2.f32 %v976_v50 }
 0xc51   :  { %v1187_v49 = vpop.eup %1186 }
 0xc52   :  { %540 = vrot.lane.b32.xlu1 %v1187_v49, %s1287_s18 }
 0xc53   :  { %v1189_v51 = vpop.eup %1188 }
 0xc54   :  { %v531_v52 = vadd.f32 1.0, %v1189_v51 }
 0xc56   :  { %1190 = vrcp.f32 %v531_v52 }
 0xc63   :  { %v1191_v53 = vpop.eup %1190 }
 0xc64   :  { %v538_v57 = vmul.f32 %v1191_v53, %v536_v56 }
 0xcc4   :  { %v541_v54 = vpop.permute.xlu1 %540 }
 0xcc5   :  { %v543_v55 = vmul.f32 %v1191_v53, %v541_v54 }
 0xcc7   :  { %545 = vrot.lane.b32.xlu0 %v543_v55, %s1293_s0 }
 0xd39   :  { %v546_v58 = vpop.permute.xlu0 %545 }
 0xd3a   :  { %v548_v59 = vadd.f32 %v546_v58, %v538_v57 }
 0xd3c   :  { %1192 = vtanh.f32 %v548_v59  ;;  %v615_v17 = vrot.slane %v548_v59, 7 }
 0xd49   :  { %v1193_v60 = vpop.eup %1192 }
 0xd4a   :  { %551 = vrot.lane.b32.xlu1 %v1193_v60, %s1287_s18 }
 0xdbc   :  { %v552_v61 = vpop.permute.xlu1 %551 }
 0xdbd   :  { %v554_v62 = vmul.f32 %v1191_v53, %v552_v61 }
 0xdbf   :  { %v555_v63 = vpack.c.bf16 %v554_v62, %v554_v62 }
 0xdc1   :  { %v557_v0 = vrot.slane %v555_v63, 2 }
 0xdc3   :  { %558 = vrot.lane.b32.xlu0 %v557_v0, %s1293_s0 }
 0xe35   :  { %v559_v2 = vpop.permute.xlu0 %558 }
 0xe36   :  { %1085 = vmatmul.mubr.msk.bf16.vlgmr.msra.gmra.mxu0 %vm168_vm3, %v559_v2 }
 0xe37   :  { %1097 = vmatpush3.bf16.msra.mxu0 %v1343_v5  ;;  %1100 = vmatprep.mubr.msk.bf16.mxu0 %vm1292_vm0, %v1291_v1 }
 0xe38   :  { %1098 = vmatprep.subr.bf16.mxu0 %v1291_v1 }
 0xe3b   :  { %1099 = vmatpush3.bf16.msra.mxu0 %v1346_v6 }
 0xe3c   :  { %1112 = vmatprep.subr.bf16.mxu0 %v1291_v1 }
 0xef6   :  { %v597_v3 = vpop.f32.mrf.mxu0 }
 0xef7   :  { %v604_v4 = vrot.slane %v597_v3, 3 }
 0xef8   :  { %v1086_v7 = vpop.f32.mrf.mxu0 }
 0xef9   :  { %v606_v8 = vadd.f32 %v604_v4, %v1366_v11  ;;  %v1144_v4 = vld [vmem:[#allocation2 + $0x18] sm:$0xff]   ;;  %v1145_v7 = vld [vmem:[#allocation2 + $0x10] sm:$0xff]  }
 0xefa   :  { %v600_v9 = vpop.f32.mrf.mxu0 }
 0xefb   :  { %1194 = vtanh.f32 %v606_v8  ;;  %v978_v5 = vmul.f32 -1.442695, %v606_v8  ;;  %v1146_v9 = vld [vmem:[#allocation2 + $0x58] sm:$0xff]  }
 0xefc   :  { %v1087_v10 = vpop.f32.mrf.mxu0 }
 0xefd   :  { %1196 = vpow2.f32 %v978_v5  ;;  %v1147_v10 = vld [vmem:[#allocation2 + $0x50] sm:$0xff]  }
 0xf08   :  { %v1195_v12 = vpop.eup %1194 }
 0xf09   :  { %619 = vrot.lane.b32.xlu1 %v1195_v12, %s1287_s18 }
 0xf0a   :  { %v1197_v13 = vpop.eup %1196 }
 0xf0b   :  { %v610_v14 = vadd.f32 1.0, %v1197_v13  ;;  %v1148_v13 = vld [vmem:[#allocation2 + $0x48] sm:$0xff]  }
 0xf0d   :  { %1198 = vrcp.f32 %v610_v14 }
 0xf1a   :  { %v1199_v15 = vpop.eup %1198 }
 0xf1b   :  { %v617_v18 = vmul.f32 %v1199_v15, %v615_v17  ;;  %v1149_v17 = vld [vmem:[#allocation2 + $0x40] sm:$0xff]  }
 0xf7b   :  { %v620_v6 = vpop.permute.xlu1 %619 }
 0xf7c   :  { %v622_v16 = vmul.f32 %v1199_v15, %v620_v6 }
 0xf7e   :  { %624 = vrot.lane.b32.xlu0 %v622_v16, %s1293_s0 }
 0xff0   :  { %v625_v19 = vpop.permute.xlu0 %624 }
 0xff1   :  { %v627_v20 = vadd.f32 %v625_v19, %v617_v18  ;;  %v1150_v18 = vld [vmem:[#allocation2 + $0x38] sm:$0xff]   ;;  %v1151_v19 = vld [vmem:[#allocation2 + $0x30] sm:$0xff]  }
 0xff3   :  { %1200 = vtanh.f32 %v627_v20  ;;  %v696_v41 = vrot.slane %v627_v20, 7  ;;  %v1152_v20 = vld [vmem:[#allocation2 + $0x28] sm:$0xff]  }
0x1000   :  { %v1201_v21 = vpop.eup %1200 }
0x1001   :  { %630 = vrot.lane.b32.xlu1 %v1201_v21, %s1287_s18  ;;  %v1153_v21 = vld [vmem:[#allocation2 + $0x20] sm:$0xff]  }
0x1073   :  { %v631_v22 = vpop.permute.xlu1 %630 }
0x1074   :  { %v633_v23 = vmul.f32 %v1199_v15, %v631_v22  ;;  %v154_v22 = vld [vmem:[#allocation5] sm:$0x1] }
0x1076   :  { %v634_v24 = vpack.c.bf16 %v633_v23, %v633_v23 }
0x1078   :  { %v636_v25 = vshrl.u32 %v634_v24, 16 }
0x107a   :  { %v638_v26 = vrot.slane %v636_v25, 2 }
0x107c   :  { %639 = vrot.lane.b32.xlu0 %v638_v26, %s1293_s0 }
0x10ee   :  { %v640_v27 = vpop.permute.xlu0 %639 }
0x10ef   :  { %1093 = vmatmul.mubr.msk.bf16.vlgmr.msra.gmra.mxu1 %vm168_vm3, %v640_v27 }
0x10f0   :  { %1108 = vmatprep.mubr.msk.bf16.mxu1 %vm1292_vm0, %v1291_v1  ;;  %1105 = vmatpush3.bf16.msra.mxu1 %v1144_v4 }
0x10f1   :  { %1106 = vmatprep.subr.bf16.mxu1 %v1291_v1 }
0x10f4   :  { %1107 = vmatpush3.bf16.msra.mxu1 %v1145_v7 }
0x11af   :  { %v678_v28 = vpop.f32.mrf.mxu1 }
0x11b0   :  { %v685_v29 = vrot.slane %v678_v28, 2 }
0x11b1   :  { %v1094_v30 = vpop.f32.mrf.mxu1 }
0x11b2   :  { %v687_v31 = vadd.f32 %v685_v29, %v1366_v11  ;;  %v155_v30 = vld [vmem:[#allocation5 + $0x1] sm:$0x1] }
0x11b3   :  { %v681_v32 = vpop.f32.mrf.mxu1 }
0x11b4   :  { %1202 = vtanh.f32 %v687_v31  ;;  %v980_v35 = vmul.f32 -1.442695, %v687_v31 }
0x11b5   :  { %v1095_v33 = vpop.f32.mrf.mxu1 }
0x11b6   :  { %1204 = vpow2.f32 %v980_v35 }
0x11c1   :  { %v1203_v34 = vpop.eup %1202 }
0x11c2   :  { %700 = vrot.lane.b32.xlu1 %v1203_v34, %s1287_s18 }
0x11c3   :  { %v1205_v36 = vpop.eup %1204 }
0x11c4   :  { %v691_v37 = vadd.f32 1.0, %v1205_v36 }
0x11c6   :  { %1206 = vrcp.f32 %v691_v37 }
0x11d3   :  { %v1207_v38 = vpop.eup %1206 }
0x11d4   :  { %v698_v42 = vmul.f32 %v1207_v38, %v696_v41 }
0x1234   :  { %v701_v39 = vpop.permute.xlu1 %700 }
0x1235   :  { %v703_v40 = vmul.f32 %v1207_v38, %v701_v39 }
0x1237   :  { %705 = vrot.lane.b32.xlu0 %v703_v40, %s1293_s0 }
0x12a9   :  { %v706_v43 = vpop.permute.xlu0 %705 }
0x12aa   :  { %v708_v44 = vadd.f32 %v706_v43, %v698_v42 }
0x12ac   :  { %1208 = vtanh.f32 %v708_v44  ;;  %v775_v0 = vrot.slane %v708_v44, 7 }
0x12b9   :  { %v1209_v45 = vpop.eup %1208 }
0x12ba   :  { %711 = vrot.lane.b32.xlu1 %v1209_v45, %s1287_s18 }
0x132c   :  { %v712_v46 = vpop.permute.xlu1 %711 }
0x132d   :  { %v714_v47 = vmul.f32 %v1207_v38, %v712_v46 }
0x132f   :  { %v715_v48 = vpack.c.bf16 %v714_v47, %v714_v47 }
0x1331   :  { %v717_v49 = vrot.slane %v715_v48, 3 }
0x1333   :  { %718 = vrot.lane.b32.xlu0 %v717_v49, %s1293_s0 }
0x13a5   :  { %v719_v50 = vpop.permute.xlu0 %718 }
0x13a6   :  { %1101 = vmatmul.mubr.msk.bf16.vlgmr.msra.gmra.mxu0 %vm168_vm3, %v719_v50 }
0x13a7   :  { %1128 = vmatprep.mubr.msk.bf16.mxu0 %vm1292_vm0, %v1291_v1  ;;  %1113 = vmatpush3.bf16.msra.mxu0 %v1146_v9 }
0x13a8   :  { %1114 = vmatprep.subr.bf16.mxu0 %v1291_v1 }
0x13ab   :  { %1115 = vmatpush3.bf16.msra.mxu0 %v1147_v10 }
0x13ac   :  { %1116 = vmatprep.subr.bf16.mxu0 %v1291_v1 }
0x13af   :  { %1117 = vmatpush3.bf16.msra.mxu0 %v1148_v13 }
0x13b0   :  { %1118 = vmatprep.subr.bf16.mxu0 %v1291_v1 }
0x13b3   :  { %1119 = vmatpush3.bf16.msra.mxu0 %v1149_v17 }
0x13b4   :  { %1120 = vmatprep.subr.bf16.mxu0 %v1291_v1 }
0x13b7   :  { %1121 = vmatpush3.bf16.msra.mxu0 %v1150_v18 }
0x13b8   :  { %1122 = vmatprep.subr.bf16.mxu0 %v1291_v1 }
0x13bb   :  { %1123 = vmatpush3.bf16.msra.mxu0 %v1151_v19 }
0x13bc   :  { %1124 = vmatprep.subr.bf16.mxu0 %v1291_v1 }
0x13bf   :  { %1125 = vmatpush3.bf16.msra.mxu0 %v1152_v20 }
0x13c0   :  { %1126 = vmatprep.subr.bf16.mxu0 %v1291_v1 }
0x13c3   :  { %1127 = vmatpush3.bf16.msra.mxu0 %v1153_v21 }
0x1466   :  { %v757_v51 = vpop.f32.mrf.mxu0 }
0x1467   :  { %v764_v52 = vrot.slane %v757_v51, 1 }
0x1468   :  { %v1102_v53 = vpop.f32.mrf.mxu0 }
0x1469   :  { %v766_v54 = vadd.f32 %v764_v52, %v1366_v11 }
0x146a   :  { %v760_v55 = vpop.f32.mrf.mxu0 }
0x146b   :  { %1210 = vtanh.f32 %v766_v54  ;;  %v982_v58 = vmul.f32 -1.442695, %v766_v54 }
0x146c   :  { %v1103_v56 = vpop.f32.mrf.mxu0 }
0x146d   :  { %1212 = vpow2.f32 %v982_v58 }
0x1478   :  { %v1211_v57 = vpop.eup %1210 }
0x1479   :  { %779 = vrot.lane.b32.xlu1 %v1211_v57, %s1287_s18 }
0x147a   :  { %v1213_v59 = vpop.eup %1212 }
0x147b   :  { %v770_v60 = vadd.f32 1.0, %v1213_v59 }
0x147d   :  { %1214 = vrcp.f32 %v770_v60 }
0x148a   :  { %v1215_v61 = vpop.eup %1214 }
0x148b   :  { %v777_v2 = vmul.f32 %v1215_v61, %v775_v0 }
0x14eb   :  { %v780_v62 = vpop.permute.xlu1 %779 }
0x14ec   :  { %v782_v63 = vmul.f32 %v1215_v61, %v780_v62 }
0x14ee   :  { %784 = vrot.lane.b32.xlu0 %v782_v63, %s1293_s0 }
0x1560   :  { %v785_v3 = vpop.permute.xlu0 %784 }
0x1561   :  { %v787_v11 = vadd.f32 %v785_v3, %v777_v2 }
0x1563   :  { %1216 = vtanh.f32 %v787_v11 }
0x1570   :  { %v1217_v8 = vpop.eup %1216 }
0x1571   :  { %790 = vrot.lane.b32.xlu1 %v1217_v8, %s1287_s18 }
0x15e3   :  { %v791_v12 = vpop.permute.xlu1 %790 }
0x15e4   :  { %v793_v5 = vmul.f32 %v1215_v61, %v791_v12 }
0x15e6   :  { %v794_v14 = vpack.c.bf16 %v793_v5, %v793_v5 }
0x15e8   :  { %v796_v15 = vshrl.u32 %v794_v14, 16 }
0x15ea   :  { %v798_v6 = vrot.slane %v796_v15, 3 }
0x15ec   :  { %799 = vrot.lane.b32.xlu0 %v798_v6, %s1293_s0 }
0x165e   :  { %v800_v16 = vpop.permute.xlu0 %799 }
0x165f   :  { %1109 = vmatmul.mubr.msk.bf16.vlgmr.msra.gmra.mxu1 %vm168_vm3, %v800_v16 }
0x171f   :  { %v850_v23 = vpop.f32.mrf.mxu1 }
0x1720   :  { %v851_v24 = vadd.f32 %v850_v23, %v154_v22 }
0x1721   :  { %v1110_v25 = vpop.f32.mrf.mxu1 }
0x1722   :  { %1218 = vtanh.f32 %v851_v24 }
0x1723   :  { %v853_v26 = vpop.f32.mrf.mxu1 }
0x1725   :  { %v1111_v27 = vpop.f32.mrf.mxu1 }
0x172f   :  { %v1219_v28 = vpop.eup %1218 }
0x1730   :  { %v857_v29 = vpack.c.bf16 %v1219_v28, %v1219_v28 }
0x1732   :  { %1129 = vmatmul.mubr.bf16.vlgmr.msra.gmra.mxu0 %v857_v29 }
0x17f2   :  { %v940_v31 = vpop.f32.mrf.mxu0 }
0x17f3   :  { %v941_v32 = vadd.f32 %v940_v31, %v155_v30 }
0x17f4   :  { %v1130_v1 = vpop.f32.mrf.mxu0 }
0x17f5   :  { %947 = vst.msk [vmem:[#allocation7] sm:$0x1] %vm946_vm4, %v941_v32 }
0x17f6   :  { %v943_v33 = vpop.f32.mrf.mxu0 }
0x17f7   :  { %1271 = shalt.err (!%p1268_p0)
}
0x17f8   :  { %957 = dma.vmem_to_hbm [thread:$0]  %s955_s5, 16, %s1465_s4, [#allocation4]   ;;  %v1131_v34 = vpop.f32.mrf.mxu0 }
0x17f9   :  { %1284 = dma.done.wait [#allocation4], 16  }
0x17fa   :  { %1285 = vsyncadd [#allocation4], 4294967280 }
0x17fb   :  { %961 = vsyncpa [#allocation3], 1 }
0x17fc   :  { %962 = vsyncpa [#allocation6], 1 }
0x17fd   :  { %963 = vsyncpa [#allocation4], 1 }

</bundles_post_ra>
